<compile_context>
chip_gen: v5e
topology: v5e:2x2
jax: 0.10.0
libtpu: 0.0.40
codegen_flags: <defaults>
</compile_context>

<pallas_src>
import jax
import jax.numpy as jnp
from jax.experimental import pallas as pl
from jax.experimental.pallas import tpu as pltpu
from jax.scipy.special import digamma, gammaln

# ----------------------------- configuration --------------------------------
VIEWS = 2
IN_DIM = [16, 24]          # per-view input dims
ENCODE_DIM = [32, 64]      # feature-information encoder hidden dims
PROJ_DIM = [64, 32]        # projection hidden dims
CLASSES = 4
ALPHA = 0.5
BETA = 0.5
LAMBDA_EPOCH = 50
BATCH = 8

IN0, IN1 = IN_DIM
E0, E1 = ENCODE_DIM
P0, P1 = PROJ_DIM
C = CLASSES

INMAX = max(IN_DIM)        # 24  : stacked layer-1 input width (x0 zero-padded)
E0S = 2 * E0               # 64  : stacked hidden-1 width
E1S = 2 * E1               # 128 : stacked feature width
P0S = 2 * P0               # 128 : stacked projection-hidden width
P1S = 2 * P1               # 64  : stacked projection-out width
CATW = P0S + 2 * C         # 136 : [proj-1 block-diag | logits0 | logits1]


def _align8(n):
    return (n + 7) & ~7


# --- packed parameter-slab row offsets (static, 8-row aligned) ---
_R_W1 = 0                              # (INMAX, E0S)  column-stacked layer-1
_R_W2 = _align8(_R_W1 + INMAX)         # (E0S,  E1S)   block-diagonal layer-2
_R_WCAT = _align8(_R_W2 + E0S)         # (E1S,  CATW)  block-diag proj-1 | classifier
_R_WP2 = _align8(_R_WCAT + E1S)        # (P0S,  P1S)   block-diagonal proj-2
_R_B1 = _align8(_R_WP2 + P0S)          # bias rows (one aligned row each)
_R_B2 = _R_B1 + 8
_R_BCAT = _R_B2 + 8
_R_BP2 = _R_BCAT + 8
SLAB_ROWS = _R_BP2 + 8                 # 376
SLAB_COLS = CATW                       # 136

_VMEM = pl.BlockSpec(memory_space=pltpu.MemorySpace.VMEM)


# ----------------------------- fused Pallas kernel ----------------------------
def _ctmc_fused_kernel(x0_ref, x1_ref, w_ref, ev_ref, proj_ref, xs_ref):
    """Both view encoders + projections + classifiers + Dempster combine.

    Views are stacked along the batch (sublane) axis; weights are block-diagonal,
    so each layer is a single MXU pass.  Off-view blocks hold finite garbage that
    never reaches a read column.
    """
    f32 = jnp.float32
    B = x0_ref.shape[0]

    # ---- assemble view-stacked LHS: rows [0:B]=view0 (zero-padded), [B:2B]=view1
    xs_ref[...] = jnp.zeros_like(xs_ref)
    xs_ref[0:B, 0:IN0] = x0_ref[...]
    xs_ref[B:2 * B, 0:IN1] = x1_ref[...]
    xs = xs_ref[...]                                              # (2B, INMAX)

    # ---- FeatureInforEncoder: Linear->ReLU->Linear->ReLU (one dot per layer) ----
    h = jnp.dot(xs, w_ref[_R_W1:_R_W1 + INMAX, 0:E0S],
                preferred_element_type=f32) + w_ref[_R_B1:_R_B1 + 1, 0:E0S]
    h = jnp.maximum(h, 0.0)                                       # (2B, 64)

    feat = jnp.dot(h, w_ref[_R_W2:_R_W2 + E0S, 0:E1S],
                   preferred_element_type=f32) + w_ref[_R_B2:_R_B2 + 1, 0:E1S]
    feat = jnp.maximum(feat, 0.0)                                 # (2B, 128)

    # ---- fused [projection layer-1 | modality classifier] (one MXU pass) ----
    cat = jnp.dot(feat, w_ref[_R_WCAT:_R_WCAT + E1S, 0:CATW],
                  preferred_element_type=f32) + w_ref[_R_BCAT:_R_BCAT + 1, 0:CATW]

    # logits sit lane-aligned at column 128 (start of the 2nd lane tile).
    logits = cat[:, P0S:CATW]                                     # (2B, 2C)
    # stable softplus: max(x,0) + log(1+exp(-|x|))
    ev_all = jnp.maximum(logits, 0.0) + jnp.log(1.0 + jnp.exp(-jnp.abs(logits)))
    ev0 = ev_all[0:B, 0:C]            # view0 evidence
    ev1 = ev_all[B:2 * B, C:2 * C]    # view1 evidence

    # ---- Dempster-Shafer combine_two(alpha1, alpha0), algebraically reduced ----
    # With E_v = alpha_v - 1, S_v = sum(alpha_v):
    #   b_v = E_v/S_v, u_v = c/S_v, C = sum(b0)sum(b1) - <b0,b1>
    #   e_a = b_a*S_a = [(b0*b1 + b0*u1 + b1*u0)/(1-C)] * [S0*S1*(1-C)/c]
    #       = E0*E1/c + E0 + E1          (exact: every 1/S and 1/(1-C) cancels)
    e_a = ev0 * ev1 * (1.0 / C) + ev0 + ev1

    ev_ref[0:B, :] = ev0
    ev_ref[B:2 * B, :] = ev1
    ev_ref[2 * B:3 * B, :] = e_a

    # ---- projection layer-2 + ReLU + F.normalize(p=2, dim=1) ----
    p = jnp.maximum(cat[:, 0:P0S], 0.0)                           # (2B, 128)
    pr = jnp.dot(p, w_ref[_R_WP2:_R_WP2 + P0S, 0:P1S],
                 preferred_element_type=f32) + w_ref[_R_BP2:_R_BP2 + 1, 0:P1S]
    pr = jnp.maximum(pr, 0.0)                                     # (2B, 64)
    pr0 = pr[0:B, 0:P1]
    pr1 = pr[B:2 * B, P1:2 * P1]

    def _l2norm(v):
        # F.normalize eps: x / max(||x||, 1e-12)  ==  x * rsqrt(max(||x||^2, 1e-24))
        return v * jax.lax.rsqrt(
            jnp.maximum(jnp.sum(v * v, axis=1, keepdims=True), 1e-24))

    proj_ref[0:B, :] = _l2norm(pr0)
    proj_ref[B:2 * B, :] = _l2norm(pr1)


def ctmc_fused(x0, x1, param_slab):
    """One pallas_call, 3 input DMAs, 2 output DMAs, for the whole hot path."""
    B = x0.shape[0]
    return pl.pallas_call(
        _ctmc_fused_kernel,
        out_shape=(
            jax.ShapeDtypeStruct((3 * B, CLASSES), jnp.float32),   # [ev0;ev1;e_a]
            jax.ShapeDtypeStruct((2 * B, P1), jnp.float32),        # [proj0;proj1]
        ),
        in_specs=[_VMEM, _VMEM, _VMEM],
        out_specs=(_VMEM, _VMEM),
        scratch_shapes=[pltpu.VMEM((2 * B, INMAX), jnp.float32)],
        cost_estimate=pl.CostEstimate(
            flops=1_130_000, transcendentals=300, bytes_accessed=210_000),
    )(x0, x1, param_slab)


# ----------------------------- ce_loss / KL (plain JAX glue) -------------------
# digamma / lgamma have no Mosaic lowering -> stay in XLA, called ONCE on the
# kernel's stacked (3, B, C) alphas (sum of 3 per-view means == 3 * batched mean).
def _ce_loss_batched(label, alpha, c, global_step, annealing_step):
    # alpha: (3, B, C), label: (B, C) broadcasts over the leading view axis.
    S = jnp.sum(alpha, axis=-1, keepdims=True)
    A = jnp.mean(jnp.sum(label * (digamma(S) - digamma(alpha)), axis=-1))
    annealing_coef = jnp.minimum(
        1.0, jnp.asarray(global_step, jnp.float32) / annealing_step)
    # KL( Dir(alp) || Dir(1) ), alp = (alpha-1)*(1-label) + 1
    alp = (alpha - 1.0) * (1.0 - label) + 1.0
    S_alpha = jnp.sum(alp, axis=-1, keepdims=True)
    lnB = gammaln(S_alpha) - jnp.sum(gammaln(alp), axis=-1, keepdims=True)
    lnB_uni = -gammaln(jnp.float32(c))          # sum(lgamma(1)) - lgamma(c)
    kl = (jnp.sum((alp - 1.0) * (digamma(alp) - digamma(S_alpha)),
                  axis=-1, keepdims=True) + lnB + lnB_uni)
    return A + annealing_coef * jnp.mean(kl)


# ----------------------------- full CTMC forward -------------------------------
def ctmc_forward(param_slab, X, y, global_step, mode="test"):
    assert mode in ("train", "valid", "test")

    ev_out, proj_out = ctmc_fused(X[0], X[1], param_slab)
    B = ev_out.shape[0] // 3

    evidence = {0: ev_out[0:B], 1: ev_out[B:2 * B]}
    evidence_a = ev_out[2 * B:3 * B]
    # proj_out holds the L2-normalized ProjectVectors ([view0; view1]); they only
    # feed the (unimplemented) train-mode contrastive losses.
    del proj_out

    loss = 0.0
    if mode == "train":
        # TODO(synk): SupConLoss / IntraConLoss are not defined in the reference
        # module; train-mode contrastive terms cannot be computed.
        raise NotImplementedError("train-mode contrastive losses are not available")
    loss = loss * (1.0 - BETA)

    # alpha_all = [alpha0; alpha1; alpha_a] directly from the kernel output.
    alpha_all = ev_out.reshape(3, B, CLASSES) + 1.0
    label = jax.nn.one_hot(y, CLASSES, dtype=jnp.float32)
    loss = loss + BETA * 3.0 * _ce_loss_batched(
        label, alpha_all, CLASSES, global_step, LAMBDA_EPOCH)

    return evidence, evidence_a, loss


ctmc_forward_jit = jax.jit(ctmc_forward, static_argnames=("mode",))


# ----------------------------- parameter init & packing ------------------------
def _linear_params(key, fan_in, fan_out):
    kw, kb = jax.random.split(key)
    bound = 1.0 / jnp.sqrt(jnp.float32(fan_in))
    w = jax.random.uniform(kw, (fan_in, fan_out), jnp.float32, -bound, bound)
    b = jax.random.uniform(kb, (1, fan_out), jnp.float32, -bound, bound)
    return w, b


def init_params(key):
    params = []
    for v in range(VIEWS):
        keys = jax.random.split(jax.random.fold_in(key, v), 5)
        w1, b1 = _linear_params(keys[0], IN_DIM[v], ENCODE_DIM[0])
        w2, b2 = _linear_params(keys[1], ENCODE_DIM[0], ENCODE_DIM[1])
        wp1, bp1 = _linear_params(keys[2], ENCODE_DIM[1], PROJ_DIM[0])
        wp2, bp2 = _linear_params(keys[3], PROJ_DIM[0], PROJ_DIM[1])
        wc, bc = _linear_params(keys[4], ENCODE_DIM[1], CLASSES)
        params.append((w1, b1, w2, b2, wp1, bp1, wp2, bp2, wc, bc))
    return params


def pack_params(params):
    """Pack both views' weights into one block-diagonal slab.

    Built ONCE at init time (outside the jitted forward) so no per-call concats.
    """
    (w1_0, b1_0, w2_0, b2_0, wp1_0, bp1_0, wp2_0, bp2_0, wc_0, bc_0) = params[0]
    (w1_1, b1_1, w2_1, b2_1, wp1_1, bp1_1, wp2_1, bp2_1, wc_1, bc_1) = params[1]

    slab = jnp.zeros((SLAB_ROWS, SLAB_COLS), jnp.float32)

    def put(s, r, c, a):
        return s.at[r:r + a.shape[0], c:c + a.shape[1]].set(a)

    # layer-1: column-stacked (view0 input zero-padded to INMAX rows)
    slab = put(slab, _R_W1, 0, w1_0)
    slab = put(slab, _R_W1, E0, w1_1)
    # layer-2: block-diagonal
    slab = put(slab, _R_W2, 0, w2_0)
    slab = put(slab, _R_W2 + E0, E1, w2_1)
    # fused [projection layer-1 | classifier]: block-diag proj, lane-aligned logits
    slab = put(slab, _R_WCAT, 0, wp1_0)
    slab = put(slab, _R_WCAT + E1, P0, wp1_1)
    slab = put(slab, _R_WCAT, P0S, wc_0)
    slab = put(slab, _R_WCAT + E1, P0S + C, wc_1)
    # projection layer-2: block-diagonal
    slab = put(slab, _R_WP2, 0, wp2_0)
    slab = put(slab, _R_WP2 + P0, P1, wp2_1)
    # biases (one aligned row each, per-view halves concatenated)
    slab = put(slab, _R_B1, 0, b1_0);     slab = put(slab, _R_B1, E0, b1_1)
    slab = put(slab, _R_B2, 0, b2_0);     slab = put(slab, _R_B2, E1, b2_1)
    slab = put(slab, _R_BCAT, 0, bp1_0);  slab = put(slab, _R_BCAT, P0, bp1_1)
    slab = put(slab, _R_BCAT, P0S, bc_0); slab = put(slab, _R_BCAT, P0S + C, bc_1)
    slab = put(slab, _R_BP2, 0, bp2_0);   slab = put(slab, _R_BP2, P1, bp2_1)
    return slab


# ----------------------------- main ---------------------------------------------
if __name__ == "__main__":
    key = jax.random.PRNGKey(0)
    kx0, kx1, ky, kp = jax.random.split(key, 4)

    X = {
        0: jax.random.normal(kx0, (BATCH, IN_DIM[0]), jnp.float32),
        1: jax.random.normal(kx1, (BATCH, IN_DIM[1]), jnp.float32),
    }
    y = jax.random.randint(ky, (BATCH,), 0, CLASSES, dtype=jnp.int32)

    params = init_params(kp)
    param_slab = pack_params(params)          # hoisted out of the per-call jit
    param_slab = jax.block_until_ready(param_slab)

    evidence, evidence_a, loss = ctmc_forward_jit(param_slab, X, y, 10, mode="test")

    jax.block_until_ready(evidence_a)
    jax.block_until_ready(loss)
    for v in range(VIEWS):
        jax.block_until_ready(evidence[v])

    assert evidence_a.shape == (BATCH, CLASSES)
    assert loss.shape == ()
    assert bool(jnp.isfinite(loss))
    print("KERNEL_OK")
</pallas_src>

<mosaic_0001>
module attributes {stable_mosaic.version = 11 : i64} {
  func.func @_ctmc_fused_kernel(%arg0: memref<8x16xf32, #tpu.memory_space<vmem>>, %arg1: memref<8x24xf32, #tpu.memory_space<vmem>>, %arg2: memref<376x136xf32, #tpu.memory_space<vmem>>, %arg3: memref<24x4xf32, #tpu.memory_space<vmem>>, %arg4: memref<16x32xf32, #tpu.memory_space<vmem>>, %arg5: memref<16x24xf32, #tpu.memory_space<vmem>>) attributes {dimension_semantics = [], scalar_prefetch = 0 : i64, scratch_operands = 1 : i64, tpu.core_type = #tpu.core_type<tc>} {
    %cst = arith.constant 0.000000e+00 : f32
    %0 = vector.broadcast %cst : f32 to vector<16x24xf32>
    %c0 = arith.constant 0 : index
    %c0_0 = arith.constant 0 : index
    %1 = vector.load %arg5[%c0, %c0_0] : memref<16x24xf32, #tpu.memory_space<vmem>>, vector<16x24xf32>
    tpu.vector_store %arg5[%c0, %c0_0], %0 {strides = array<i32>} : memref<16x24xf32, #tpu.memory_space<vmem>>, vector<16x24xf32>,
    %c0_1 = arith.constant 0 : index
    %c0_2 = arith.constant 0 : index
    %2 = vector.load %arg0[%c0_1, %c0_2] : memref<8x16xf32, #tpu.memory_space<vmem>>, vector<8x16xf32>
    %c0_3 = arith.constant 0 : index
    %c0_4 = arith.constant 0 : index
    %3 = vector.load %arg5[%c0_3, %c0_4] : memref<16x24xf32, #tpu.memory_space<vmem>>, vector<8x16xf32>
    tpu.vector_store %arg5[%c0_3, %c0_4], %2 {strides = array<i32>} : memref<16x24xf32, #tpu.memory_space<vmem>>, vector<8x16xf32>,
    %c0_5 = arith.constant 0 : index
    %c0_6 = arith.constant 0 : index
    %4 = vector.load %arg1[%c0_5, %c0_6] : memref<8x24xf32, #tpu.memory_space<vmem>>, vector<8x24xf32>
    %c8 = arith.constant 8 : index
    %c0_7 = arith.constant 0 : index
    %5 = vector.load %arg5[%c8, %c0_7] : memref<16x24xf32, #tpu.memory_space<vmem>>, vector<8x24xf32>
    tpu.vector_store %arg5[%c8, %c0_7], %4 {strides = array<i32>} : memref<16x24xf32, #tpu.memory_space<vmem>>, vector<8x24xf32>,
    %c0_8 = arith.constant 0 : index
    %c0_9 = arith.constant 0 : index
    %6 = vector.load %arg5[%c0_8, %c0_9] : memref<16x24xf32, #tpu.memory_space<vmem>>, vector<16x24xf32>
    %c0_10 = arith.constant 0 : index
    %c0_11 = arith.constant 0 : index
    %7 = vector.load %arg2[%c0_10, %c0_11] : memref<376x136xf32, #tpu.memory_space<vmem>>, vector<24x64xf32>
    %cst_12 = arith.constant dense<0.000000e+00> : vector<16x64xf32>
    %8 = tpu.matmul %6, %7, %cst_12 {dimension_numbers = #tpu.dot_dimension_numbers<[1], [0], [0], [1], [0, 0, 1, 1], [], []>} : vector<16x24xf32>, vector<24x64xf32>, vector<16x64xf32> -> vector<16x64xf32>
    %c344 = arith.constant 344 : index
    %c0_13 = arith.constant 0 : index
    %9 = vector.load %arg2[%c344, %c0_13] : memref<376x136xf32, #tpu.memory_space<vmem>>, vector<1x64xf32>
    %10 = vector.broadcast %9 : vector<1x64xf32> to vector<16x64xf32>
    %11 = arith.addf %8, %10 : vector<16x64xf32>
    %cst_14 = arith.constant 0.000000e+00 : f32
    %12 = vector.broadcast %cst_14 : f32 to vector<16x64xf32>
    %13 = arith.maximumf %11, %12 : vector<16x64xf32>
    %c24 = arith.constant 24 : index
    %c0_15 = arith.constant 0 : index
    %14 = vector.load %arg2[%c24, %c0_15] : memref<376x136xf32, #tpu.memory_space<vmem>>, vector<64x128xf32>
    %cst_16 = arith.constant dense<0.000000e+00> : vector<16x128xf32>
    %15 = tpu.matmul %13, %14, %cst_16 {dimension_numbers = #tpu.dot_dimension_numbers<[1], [0], [0], [1], [0, 0, 1, 1], [], []>} : vector<16x64xf32>, vector<64x128xf32>, vector<16x128xf32> -> vector<16x128xf32>
    %c352 = arith.constant 352 : index
    %c0_17 = arith.constant 0 : index
    %16 = vector.load %arg2[%c352, %c0_17] : memref<376x136xf32, #tpu.memory_space<vmem>>, vector<1x128xf32>
    %17 = vector.broadcast %16 : vector<1x128xf32> to vector<16x128xf32>
    %18 = arith.addf %15, %17 : vector<16x128xf32>
    %cst_18 = arith.constant 0.000000e+00 : f32
    %19 = vector.broadcast %cst_18 : f32 to vector<16x128xf32>
    %20 = arith.maximumf %18, %19 : vector<16x128xf32>
    %c88 = arith.constant 88 : index
    %c0_19 = arith.constant 0 : index
    %21 = vector.load %arg2[%c88, %c0_19] : memref<376x136xf32, #tpu.memory_space<vmem>>, vector<128x136xf32>
    %cst_20 = arith.constant dense<0.000000e+00> : vector<16x136xf32>
    %22 = tpu.matmul %20, %21, %cst_20 {dimension_numbers = #tpu.dot_dimension_numbers<[1], [0], [0], [1], [0, 0, 1, 1], [], []>} : vector<16x128xf32>, vector<128x136xf32>, vector<16x136xf32> -> vector<16x136xf32>
    %c360 = arith.constant 360 : index
    %c0_21 = arith.constant 0 : index
    %23 = vector.load %arg2[%c360, %c0_21] : memref<376x136xf32, #tpu.memory_space<vmem>>, vector<1x136xf32>
    %24 = vector.broadcast %23 : vector<1x136xf32> to vector<16x136xf32>
    %25 = arith.addf %22, %24 : vector<16x136xf32>
    %26 = vector.extract_strided_slice %25 {offsets = [0, 128], sizes = [16, 8], strides = [1, 1]} : vector<16x136xf32> to vector<16x8xf32>
    %cst_22 = arith.constant 0.000000e+00 : f32
    %27 = vector.broadcast %cst_22 : f32 to vector<16x8xf32>
    %28 = arith.maximumf %26, %27 : vector<16x8xf32>
    %29 = math.absf %26 : vector<16x8xf32>
    %cst_23 = arith.constant 0.000000e+00 : f32
    %30 = vector.broadcast %cst_23 : f32 to vector<16x8xf32>
    %31 = arith.subf %30, %29 : vector<16x8xf32>
    %32 = math.exp %31 : vector<16x8xf32>
    %cst_24 = arith.constant 1.000000e+00 : f32
    %33 = vector.broadcast %cst_24 : f32 to vector<16x8xf32>
    %34 = arith.addf %33, %32 : vector<16x8xf32>
    %35 = math.log %34 : vector<16x8xf32>
    %36 = arith.addf %28, %35 : vector<16x8xf32>
    %37 = vector.extract_strided_slice %36 {offsets = [0, 0], sizes = [8, 4], strides = [1, 1]} : vector<16x8xf32> to vector<8x4xf32>
    %38 = vector.extract_strided_slice %36 {offsets = [8, 4], sizes = [8, 4], strides = [1, 1]} : vector<16x8xf32> to vector<8x4xf32>
    %39 = arith.mulf %37, %38 : vector<8x4xf32>
    %cst_25 = arith.constant 2.500000e-01 : f32
    %40 = vector.broadcast %cst_25 : f32 to vector<8x4xf32>
    %41 = arith.mulf %39, %40 : vector<8x4xf32>
    %42 = arith.addf %41, %37 : vector<8x4xf32>
    %43 = arith.addf %42, %38 : vector<8x4xf32>
    %c0_26 = arith.constant 0 : index
    %c0_27 = arith.constant 0 : index
    %44 = vector.load %arg3[%c0_26, %c0_27] : memref<24x4xf32, #tpu.memory_space<vmem>>, vector<8x4xf32>
    tpu.vector_store %arg3[%c0_26, %c0_27], %37 {strides = array<i32>} : memref<24x4xf32, #tpu.memory_space<vmem>>, vector<8x4xf32>,
    %c8_28 = arith.constant 8 : index
    %c0_29 = arith.constant 0 : index
    %45 = vector.load %arg3[%c8_28, %c0_29] : memref<24x4xf32, #tpu.memory_space<vmem>>, vector<8x4xf32>
    tpu.vector_store %arg3[%c8_28, %c0_29], %38 {strides = array<i32>} : memref<24x4xf32, #tpu.memory_space<vmem>>, vector<8x4xf32>,
    %c16 = arith.constant 16 : index
    %c0_30 = arith.constant 0 : index
    %46 = vector.load %arg3[%c16, %c0_30] : memref<24x4xf32, #tpu.memory_space<vmem>>, vector<8x4xf32>
    tpu.vector_store %arg3[%c16, %c0_30], %43 {strides = array<i32>} : memref<24x4xf32, #tpu.memory_space<vmem>>, vector<8x4xf32>,
    %47 = vector.extract_strided_slice %25 {offsets = [0, 0], sizes = [16, 128], strides = [1, 1]} : vector<16x136xf32> to vector<16x128xf32>
    %cst_31 = arith.constant 0.000000e+00 : f32
    %48 = vector.broadcast %cst_31 : f32 to vector<16x128xf32>
    %49 = arith.maximumf %47, %48 : vector<16x128xf32>
    %c216 = arith.constant 216 : index
    %c0_32 = arith.constant 0 : index
    %50 = vector.load %arg2[%c216, %c0_32] : memref<376x136xf32, #tpu.memory_space<vmem>>, vector<128x64xf32>
    %cst_33 = arith.constant dense<0.000000e+00> : vector<16x64xf32>
    %51 = tpu.matmul %49, %50, %cst_33 {dimension_numbers = #tpu.dot_dimension_numbers<[1], [0], [0], [1], [0, 0, 1, 1], [], []>} : vector<16x128xf32>, vector<128x64xf32>, vector<16x64xf32> -> vector<16x64xf32>
    %c368 = arith.constant 368 : index
    %c0_34 = arith.constant 0 : index
    %52 = vector.load %arg2[%c368, %c0_34] : memref<376x136xf32, #tpu.memory_space<vmem>>, vector<1x64xf32>
    %53 = vector.broadcast %52 : vector<1x64xf32> to vector<16x64xf32>
    %54 = arith.addf %51, %53 : vector<16x64xf32>
    %cst_35 = arith.constant 0.000000e+00 : f32
    %55 = vector.broadcast %cst_35 : f32 to vector<16x64xf32>
    %56 = arith.maximumf %54, %55 : vector<16x64xf32>
    %57 = vector.extract_strided_slice %56 {offsets = [0, 0], sizes = [8, 32], strides = [1, 1]} : vector<16x64xf32> to vector<8x32xf32>
    %58 = vector.extract_strided_slice %56 {offsets = [8, 32], sizes = [8, 32], strides = [1, 1]} : vector<16x64xf32> to vector<8x32xf32>
    %59 = arith.mulf %57, %57 : vector<8x32xf32>
    %cst_36 = arith.constant dense<0.000000e+00> : vector<8xf32>
    %60 = vector.multi_reduction <add>, %59, %cst_36 [1] : vector<8x32xf32> to vector<8xf32>
    %61 = vector.shape_cast %60 : vector<8xf32> to vector<8x1xf32>
    %cst_37 = arith.constant 1.000000e-24 : f32
    %62 = vector.broadcast %cst_37 : f32 to vector<8x1xf32>
    %63 = arith.maximumf %61, %62 : vector<8x1xf32>
    %64 = math.rsqrt %63 : vector<8x1xf32>
    %65 = vector.broadcast %64 : vector<8x1xf32> to vector<8x32xf32>
    %66 = arith.mulf %57, %65 : vector<8x32xf32>
    %c0_38 = arith.constant 0 : index
    %c0_39 = arith.constant 0 : index
    %67 = vector.load %arg4[%c0_38, %c0_39] : memref<16x32xf32, #tpu.memory_space<vmem>>, vector<8x32xf32>
    tpu.vector_store %arg4[%c0_38, %c0_39], %66 {strides = array<i32>} : memref<16x32xf32, #tpu.memory_space<vmem>>, vector<8x32xf32>,
    %68 = arith.mulf %58, %58 : vector<8x32xf32>
    %cst_40 = arith.constant dense<0.000000e+00> : vector<8xf32>
    %69 = vector.multi_reduction <add>, %68, %cst_40 [1] : vector<8x32xf32> to vector<8xf32>
    %70 = vector.shape_cast %69 : vector<8xf32> to vector<8x1xf32>
    %cst_41 = arith.constant 1.000000e-24 : f32
    %71 = vector.broadcast %cst_41 : f32 to vector<8x1xf32>
    %72 = arith.maximumf %70, %71 : vector<8x1xf32>
    %73 = math.rsqrt %72 : vector<8x1xf32>
    %74 = vector.broadcast %73 : vector<8x1xf32> to vector<8x32xf32>
    %75 = arith.mulf %58, %74 : vector<8x32xf32>
    %c8_42 = arith.constant 8 : index
    %c0_43 = arith.constant 0 : index
    %76 = vector.load %arg4[%c8_42, %c0_43] : memref<16x32xf32, #tpu.memory_space<vmem>>, vector<8x32xf32>
    tpu.vector_store %arg4[%c8_42, %c0_43], %75 {strides = array<i32>} : memref<16x32xf32, #tpu.memory_space<vmem>>, vector<8x32xf32>,
    return
  }
}

</mosaic_0001>

<bundles_post_ra>
// kernel: ctmc_forward.1
= control target key start
LH: loop header
LB: loop body
LE: loop exit
PB: predicated region body
PF: predicated region fallthrough
CT: control target
= control target key end

     0   :  { %vm17_vm0 = vcmask 195584   ;;  %vm21_vm1 = vcmask 130048   ;;  %v376_v2 = vmov 0.0   ;;  %s628_s0 = inlined_call_operand.vmem [shape: f32[8,16], index: 0, kind: input, shape index: {}]   ;;  %s629_s1 = inlined_call_operand.vmem [shape: f32[8,24], index: 1, kind: input, shape index: {}]   ;;  %s630_s2 = inlined_call_operand.vmem [shape: f32[376,136], index: 2, kind: input, shape index: {}]   ;;  %s631_s3 = inlined_call_operand.vmem [shape: f32[24,4], index: 3, kind: output, shape index: {0}]   ;;  %s632_s4 = inlined_call_operand.hbm [shape: f32[16,32], index: 4, kind: output, shape index: {1}]  }
   0x1   :  { %v29_v0 = vld [vmem:[%s630_s2 + $0x20] sm:$0xff]  ;;  %v28_v1 = vld [vmem:[%s630_s2 + $0x10] sm:$0xff]  ;;  %18 = vst.msk [vmem:[#allocation2] sm:$0xff] %vm17_vm0, %v376_v2 }
   0x2   :  { %50 = vmatpush.msra.mxu1 %v29_v0  ;;  %v20_v3 = vld [vmem:[%s628_s0] sm:$0xff]  ;;  %19 = vst.msk [vmem:[#allocation2 + $0x8] sm:$0xff] %vm17_vm0, %v376_v2 }
   0x3   :  { %v23_v4 = vld [vmem:[%s629_s1] sm:$0xff]  ;;  %22 = vst.msk [vmem:[#allocation2] sm:$0xff] %vm21_vm1, %v20_v3 }
   0x4   :  { %v27_v5 = vld [vmem:[%s630_s2] sm:$0xff]  ;;  %51 = vmatpush.msra.mxu1 %v28_v1  ;;  %24 = vst.msk [vmem:[#allocation2 + $0x8] sm:$0xff] %vm17_vm0, %v23_v4 }
   0x5   :  { %v69_v6 = vld [vmem:[%s630_s2 + $0xa0] sm:$0xff] }
   0x6   :  { %10 = vsyncpa [#allocation4], 0  ;;  %52 = vmatpush.msra.mxu1 %v27_v5  ;;  %v68_v7 = vld [vmem:[%s630_s2 + $0x90] sm:$0xff]  ;;  %v67_v8 = vld [vmem:[%s630_s2 + $0x80] sm:$0xff]  ;;  %vm71_vm2 = vcmask 523264   ;;  %vm214_vm3 = vcmask 31744  }
   0x7   :  { %v66_v9 = vld [vmem:[%s630_s2 + $0x70] sm:$0xff]  ;;  %v65_v11 = vld [vmem:[%s630_s2 + $0x60] sm:$0xff]  ;;  %v134_v17 = vld [vmem:[%s630_s2 + $0x1a8] sm:$0xff]  ;;  %vm263_vm4 = vcmask 261120   ;;  %s377_s7 = smov 96   ;;  %s379_s12 = smov [#allocation3]  }
   0x8   :  { %86 = vmatpush.msrb.mxu1 %v69_v6  ;;  %v64_v12 = vld [vmem:[%s630_s2 + $0x50] sm:$0xff]  ;;  %v63_v14 = vld [vmem:[%s630_s2 + $0x40] sm:$0xff]  ;;  %165 = vmatpush.msra.mxu3 %v134_v17  ;;  %v132_v19 = vld [vmem:[%s630_s2 + $0x198] sm:$0xff]  ;;  %s311_s13 = sshll.u32 %s379_s12, 4  ;;  %s313_s15 = sshll.u32 %s632_s4, 4  ;;  %s312_s13 = int_to_ptr.vmem [resolvable:$true] %s311_s13  ;;  %s314_s15 = int_to_ptr.hbm [resolvable:$true] %s313_s15 }
   0x9   :  { %v62_v15 = vld [vmem:[%s630_s2 + $0x30] sm:$0xff]  ;;  %v133_v16 = vld [vmem:[%s630_s2 + $0x1a0] sm:$0xff]  ;;  %v130_v21 = vld [vmem:[%s630_s2 + $0x188] sm:$0xff]  ;;  %s380_s16 = smov 128   ;;  %s381_s17 = smov 8  }
   0xa   :  { %87 = vmatpush.msrb.mxu1 %v68_v7  ;;  %v25_v10 = vld [vmem:[#allocation2] sm:$0xff]  ;;  %v131_v18 = vld [vmem:[%s630_s2 + $0x190] sm:$0xff]  ;;  %142 = vmatpush.msra.mxu2 %v133_v16  ;;  %v128_v23 = vld [vmem:[%s630_s2 + $0x178] sm:$0xff] }
   0xb   :  { %327 = vmatmul.msk.f32.vlgmr.msra.gmra.mxu1 %vm17_vm0, %v25_v10  ;;  %v26_v13 = vld [vmem:[#allocation2 + $0x8] sm:$0xff]  ;;  %v129_v20 = vld [vmem:[%s630_s2 + $0x180] sm:$0xff]  ;;  %166 = vmatpush.msra.mxu3 %v132_v19  ;;  %v127_v22 = vld [vmem:[%s630_s2 + $0x170] sm:$0xff] }
   0xc   :  { %88 = vmatpush.msrb.mxu1 %v67_v8  ;;  %143 = vmatpush.msra.mxu2 %v131_v18  ;;  %v125_v24 = vld [vmem:[%s630_s2 + $0x160] sm:$0xff]  ;;  %v126_v25 = vld [vmem:[%s630_s2 + $0x168] sm:$0xff]  ;;  %v123_v26 = vld [vmem:[%s630_s2 + $0x150] sm:$0xff] }
   0xd   :  { %167 = vmatpush.msra.mxu3 %v130_v21  ;;  %v124_v27 = vld [vmem:[%s630_s2 + $0x158] sm:$0xff]  ;;  %v121_v28 = vld [vmem:[%s630_s2 + $0x140] sm:$0xff]  ;;  %v122_v29 = vld [vmem:[%s630_s2 + $0x148] sm:$0xff] }
   0xe   :  { %89 = vmatpush.msrb.mxu1 %v66_v9  ;;  %144 = vmatpush.msra.mxu2 %v129_v20  ;;  %v119_v30 = vld [vmem:[%s630_s2 + $0x130] sm:$0xff]  ;;  %v120_v31 = vld [vmem:[%s630_s2 + $0x138] sm:$0xff]  ;;  %v117_v32 = vld [vmem:[%s630_s2 + $0x120] sm:$0xff] }
   0xf   :  { %168 = vmatpush.msra.mxu3 %v128_v23  ;;  %v118_v33 = vld [vmem:[%s630_s2 + $0x128] sm:$0xff]  ;;  %v115_v34 = vld [vmem:[%s630_s2 + $0x110] sm:$0xff]  ;;  %v116_v35 = vld [vmem:[%s630_s2 + $0x118] sm:$0xff] }
  0x10   :  { %90 = vmatpush.msrb.mxu1 %v65_v11  ;;  %145 = vmatpush.msra.mxu2 %v127_v22  ;;  %v30_v36 = vld [vmem:[%s630_s2 + $0x2b0] ss:$0 sm:$0xff]  ;;  %v113_v37 = vld [vmem:[%s630_s2 + $0x100] sm:$0xff]  ;;  %v114_v38 = vld [vmem:[%s630_s2 + $0x108] sm:$0xff] }
  0x11   :  { %169 = vmatpush.msra.mxu3 %v126_v25  ;;  %v111_v41 = vld [vmem:[%s630_s2 + $0xf0] sm:$0xff]  ;;  %v112_v42 = vld [vmem:[%s630_s2 + $0xf8] sm:$0xff]  ;;  %v109_v44 = vld [vmem:[%s630_s2 + $0xe0] sm:$0xff] }
  0x12   :  { %91 = vmatpush.msrb.mxu1 %v64_v12  ;;  %146 = vmatpush.msra.mxu2 %v125_v24  ;;  %v110_v45 = vld [vmem:[%s630_s2 + $0xe8] sm:$0xff]  ;;  %v107_v49 = vld [vmem:[%s630_s2 + $0xd0] sm:$0xff]  ;;  %v108_v50 = vld [vmem:[%s630_s2 + $0xd8] sm:$0xff] }
  0x13   :  { %328 = vmatmul.msk.f32.gmra.mxu1 %vm17_vm0, %v26_v13  ;;  %170 = vmatpush.msra.mxu3 %v124_v27  ;;  %v105_v51 = vld [vmem:[%s630_s2 + $0xc0] sm:$0xff]  ;;  %v106_v52 = vld [vmem:[%s630_s2 + $0xc8] sm:$0xff]  ;;  %v103_v53 = vld [vmem:[%s630_s2 + $0xb0] sm:$0xff] }
  0x14   :  { %92 = vmatpush.msrb.mxu1 %v63_v14  ;;  %147 = vmatpush.msra.mxu2 %v123_v26  ;;  %v104_v54 = vld [vmem:[%s630_s2 + $0xb8] sm:$0xff]  ;;  %v235_v55 = vld [vmem:[%s630_s2 + $0x2a0] sm:$0xff]  ;;  %v234_v56 = vld [vmem:[%s630_s2 + $0x290] sm:$0xff] }
  0x15   :  { %171 = vmatpush.msra.mxu3 %v122_v29  ;;  %237 = vmatpush.msra.mxu0 %v235_v55  ;;  %v233_v57 = vld [vmem:[%s630_s2 + $0x280] sm:$0xff]  ;;  %v232_v58 = vld [vmem:[%s630_s2 + $0x270] sm:$0xff] }
  0x16   :  { %93 = vmatpush.msrb.mxu1 %v62_v15  ;;  %148 = vmatpush.msra.mxu2 %v121_v28  ;;  %v231_v59 = vld [vmem:[%s630_s2 + $0x260] sm:$0xff]  ;;  %v230_v60 = vld [vmem:[%s630_s2 + $0x250] sm:$0xff] }
  0x17   :  { %172 = vmatpush.msra.mxu3 %v120_v31  ;;  %238 = vmatpush.msra.mxu0 %v234_v56  ;;  %v229_v61 = vld [vmem:[%s630_s2 + $0x240] sm:$0xff]  ;;  %v228_v62 = vld [vmem:[%s630_s2 + $0x230] sm:$0xff] }
  0x18   :  { %149 = vmatpush.msra.mxu2 %v119_v30  ;;  %v227_v63 = vld [vmem:[%s630_s2 + $0x220] sm:$0xff]  ;;  %v226_v0 = vld [vmem:[%s630_s2 + $0x210] sm:$0xff] }
  0x19   :  { %173 = vmatpush.msra.mxu3 %v118_v33  ;;  %239 = vmatpush.msra.mxu0 %v233_v57  ;;  %v70_v1 = vld [vmem:[%s630_s2 + $0x2c0] ss:$0 sm:$0xff]  ;;  %v224_v5 = vld [vmem:[%s630_s2 + $0x1f0] sm:$0xff] }
  0x1a   :  { %150 = vmatpush.msra.mxu2 %v117_v32  ;;  %v225_v2 = vld [vmem:[%s630_s2 + $0x200] sm:$0xff]  ;;  %v222_v11 = vld [vmem:[%s630_s2 + $0x1d0] sm:$0xff] }
  0x1b   :  { %174 = vmatpush.msra.mxu3 %v116_v35  ;;  %240 = vmatpush.msra.mxu0 %v232_v58  ;;  %v223_v7 = vld [vmem:[%s630_s2 + $0x1e0] sm:$0xff]  ;;  %v220_v13 = vld [vmem:[%s630_s2 + $0x1b0] sm:$0xff] }
  0x1c   :  { %151 = vmatpush.msra.mxu2 %v115_v34  ;;  %v221_v12 = vld [vmem:[%s630_s2 + $0x1c0] sm:$0xff]  ;;  %v331_v14 = vld [vmem:[%s630_s2 + $0x2d0] ss:$8 sm:$0x3] }
  0x1d   :  { %175 = vmatpush.msra.mxu3 %v114_v38  ;;  %241 = vmatpush.msra.mxu0 %v231_v59  ;;  %v138_v15 = vperm.slane %v331_v14, 0  ;;  %v139_v16 = vperm.slane %v331_v14, 1  ;;  %v236_v38 = vld [vmem:[%s630_s2 + $0x2e0] ss:$0 sm:$0xff]  ;;  %s378_s2 = smov 124  }
  0x1e   :  { %152 = vmatpush.msra.mxu2 %v113_v37 }
  0x1f   :  { %176 = vmatpush.msra.mxu3 %v112_v42  ;;  %242 = vmatpush.msra.mxu0 %v230_v60 }
  0x20   :  { %153 = vmatpush.msra.mxu2 %v111_v41 }
  0x21   :  { %177 = vmatpush.msra.mxu3 %v110_v45  ;;  %243 = vmatpush.msra.mxu0 %v229_v61 }
  0x22   :  { %154 = vmatpush.msra.mxu2 %v109_v44 }
  0x23   :  { %178 = vmatpush.msra.mxu3 %v108_v50  ;;  %244 = vmatpush.msra.mxu0 %v228_v62 }
  0x24   :  { %155 = vmatpush.msra.mxu2 %v107_v49 }
  0x25   :  { %179 = vmatpush.msra.mxu3 %v106_v52  ;;  %245 = vmatpush.msra.mxu0 %v227_v63 }
  0x26   :  { %156 = vmatpush.msra.mxu2 %v105_v51 }
  0x27   :  { %180 = vmatpush.msra.mxu3 %v104_v54  ;;  %246 = vmatpush.msra.mxu0 %v226_v0 }
  0x28   :  { %157 = vmatpush.msra.mxu2 %v103_v53 }
  0x29   :  { %247 = vmatpush.msra.mxu0 %v225_v2 }
  0x2b   :  { %248 = vmatpush.msra.mxu0 %v224_v5 }
  0x2d   :  { %249 = vmatpush.msra.mxu0 %v223_v7 }
  0x2f   :  { %250 = vmatpush.msra.mxu0 %v222_v11 }
  0x31   :  { %251 = vmatpush.msra.mxu0 %v221_v12 }
  0x33   :  { %252 = vmatpush.msra.mxu0 %v220_v13 }
  0x88   :  { %v54_v39 = vpop.f32.mrf.mxu1 }
  0x89   :  { %v55_v40 = vadd.f32 %v54_v39, %v30_v36 }
  0x8b   :  { %v60_v43 = vmax.f32 %v55_v40, 0.0 }
  0x8d   :  { %329 = vmatmul.msk.f32.vlgmr.msrb.gmra.mxu1 %vm71_vm2, %v60_v43 }
  0x90   :  { %v57_v46 = vpop.f32.mrf.mxu1 }
  0x91   :  { %v58_v47 = vadd.f32 %v57_v46, %v30_v36 }
  0x93   :  { %v61_v48 = vmax.f32 %v58_v47, 0.0 }
  0x95   :  { %330 = vmatmul.msk.f32.gmra.mxu1 %vm71_vm2, %v61_v48 }
 0x10a   :  { %v95_v3 = vpop.f32.mrf.mxu1 }
 0x10b   :  { %v96_v4 = vadd.f32 %v95_v3, %v70_v1 }
 0x10d   :  { %v101_v6 = vmax.f32 %v96_v4, 0.0 }
 0x10f   :  { %158 = vmatmul.f32.vlgmr.msra.gmra.mxu2 %v101_v6  ;;  %181 = vmatmul.f32.vlgmr.msra.gmra.mxu3 %v101_v6 }
 0x112   :  { %v98_v8 = vpop.f32.mrf.mxu1 }
 0x113   :  { %v99_v9 = vadd.f32 %v98_v8, %v70_v1 }
 0x115   :  { %v102_v10 = vmax.f32 %v99_v9, 0.0 }
 0x117   :  { %161 = vmatmul.f32.gmra.mxu2 %v102_v10  ;;  %184 = vmatmul.f32.gmra.mxu3 %v102_v10 }
 0x192   :  { %v159_v17 = vpop.f32.mrf.mxu2  ;;  %v182_v18 = vpop.f32.mrf.mxu3 }
 0x193   :  { %v160_v19 = vadd.f32 %v159_v17, %v138_v15  ;;  %v183_v20 = vadd.f32 %v182_v18, %v139_v16 }
 0x195   :  { %v218_v21 = vmax.f32 %v160_v19, 0.0  ;;  %v190_v22 = vand.u32 2147483647, %v183_v20  ;;  %v188_v31 = vmax.f32 %v183_v20, 0.0 }
 0x197   :  { %v192_v23 = vsub.f32 0.0, %v190_v22  ;;  %253 = vmatmul.f32.vlgmr.msra.gmra.mxu0 %v218_v21 }
 0x199   :  { %v194_v24 = vmul.f32 1.442695, %v192_v23 }
 0x19a   :  { %v162_v25 = vpop.f32.mrf.mxu2  ;;  %v185_v34 = vpop.f32.mrf.mxu3 }
 0x19b   :  { %338 = vpow2.f32 %v194_v24  ;;  %v163_v26 = vadd.f32 %v162_v25, %v138_v15  ;;  %v186_v35 = vadd.f32 %v185_v34, %v139_v16 }
 0x19d   :  { %v219_v27 = vmax.f32 %v163_v26, 0.0  ;;  %v191_v36 = vand.u32 2147483647, %v186_v35  ;;  %v189_v53 = vmax.f32 %v186_v35, 0.0 }
 0x19f   :  { %256 = vmatmul.f32.gmra.mxu0 %v219_v27  ;;  %v193_v37 = vsub.f32 0.0, %v191_v36 }
 0x1a1   :  { %v339_v28 = vpop.eup %338  ;;  %v196_v40 = vmul.f32 1.442695, %v193_v37 }
 0x1a2   :  { %v198_v29 = vadd.f32 1.0, %v339_v28 }
 0x1a4   :  { %340 = vlog2.f32 %v198_v29 }
 0x1a5   :  { %342 = vpow2.f32 %v196_v40 }
 0x1aa   :  { %v341_v30 = vpop.eup %340 }
 0x1ab   :  { %v201_v32 = vmul.f32 0.6931472, %v341_v30  ;;  %v343_v47 = vpop.eup %342 }
 0x1ac   :  { %v199_v50 = vadd.f32 1.0, %v343_v47 }
 0x1ad   :  { %v204_v33 = vadd.f32 %v201_v32, %v188_v31 }
 0x1ae   :  { %344 = vlog2.f32 %v199_v50 }
 0x1af   :  { %215 = vst.msk [vmem:[%s631_s3] sm:$0xff] %vm214_vm3, %v204_v33 }
 0x1b4   :  { %v345_v51 = vpop.eup %344 }
 0x1b5   :  { %v203_v52 = vmul.f32 0.6931472, %v345_v51 }
 0x1b7   :  { %v205_v54 = vadd.f32 %v203_v52, %v189_v53 }
 0x214   :  { %v254_v39 = vpop.f32.mrf.mxu0 }
 0x215   :  { %v255_v41 = vadd.f32 %v254_v39, %v236_v38 }
 0x217   :  { %v260_v42 = vmax.f32 %v255_v41, 0.0 }
 0x219   :  { %v262_v43 = vmul.f32 %v260_v42, %v260_v42 }
 0x21b   :  { %v264_v44 = vsel %vm263_vm4, %v262_v43, 0.0 }
 0x21c   :  { %v257_v45 = vpop.f32.mrf.mxu0  ;;  %265 = vadd.xlane.f32.xlu1 %v264_v44 }
 0x21d   :  { %v258_v46 = vadd.f32 %v257_v45, %v236_v38 }
 0x21f   :  { %v261_v48 = vmax.f32 %v258_v46, 0.0 }
 0x221   :  { %v280_v49 = vmul.f32 %v261_v48, %v261_v48 }
 0x223   :  { %282 = vrot.lane.b32.xlu0 %v280_v49, %s377_s7 }
 0x235   :  { %207 = vrot.lane.b32.xlu1 %v205_v54, %s378_s2 }
 0x28f   :  { %v266_v55 = vpop.xlane.xlu1 %265 }
 0x290   :  { %v267_v56 = vmax.f32 %v266_v55, 1e-24 }
 0x292   :  { %346 = vrsqrt.f32 %v267_v56  ;;  %vm274_vm6 = vweird.f32 %v267_v56 }
 0x295   :  { %v283_v57 = vpop.permute.xlu0 %282 }
 0x296   :  { %v285_v58 = vsel %vm263_vm4, %v283_v57, 0.0 }
 0x297   :  { %286 = vadd.xlane.f32.xlu0 %v285_v58 }
 0x298   :  { %v347_v59 = vpop.eup %346 }
 0x299   :  { %v269_v60 = vmul.f32 %v347_v59, %v267_v56  ;;  %vm275_vm5 = vweird.f32 %v347_v59 }
 0x29a   :  { %vm276_vm7 = vmor %vm274_vm6, %vm275_vm5 }
 0x29b   :  { %v270_v61 = vmul.f32 %v347_v59, %v269_v60 }
 0x29d   :  { %v271_v62 = vmul.f32 0.5, %v270_v61 }
 0x29f   :  { %v272_v63 = vsub.f32 1.5, %v271_v62 }
 0x2a1   :  { %v273_v0 = vmul.f32 %v347_v59, %v272_v63 }
 0x2a3   :  { %v277_v1 = vsel %vm276_vm7, %v347_v59, %v273_v0 }
 0x2a4   :  { %v278_v2 = vmul.f32 %v277_v1, %v260_v42 }
 0x2a6   :  { %279 = vst.msk [vmem:[#allocation3] sm:$0xff] %vm263_vm4, %v278_v2 }
 0x2a7   :  { %v208_v3 = vpop.permute.xlu1 %207 }
 0x2a8   :  { %v210_v4 = vmul.f32 %v208_v3, %v204_v33  ;;  %216 = vst.msk [vmem:[%s631_s3 + $0x8] sm:$0xff] %vm214_vm3, %v208_v3 }
 0x2aa   :  { %v211_v5 = vmul.f32 0.25, %v210_v4 }
 0x2ac   :  { %v212_v6 = vadd.f32 %v211_v5, %v204_v33 }
 0x2ae   :  { %v213_v7 = vadd.f32 %v212_v6, %v208_v3 }
 0x2b0   :  { %217 = vst.msk [vmem:[%s631_s3 + $0x10] sm:$0xff] %vm214_vm3, %v213_v7 }
 0x30a   :  { %v287_v8 = vpop.xlane.xlu0 %286 }
 0x30b   :  { %v288_v9 = vmax.f32 %v287_v8, 1e-24 }
 0x30d   :  { %348 = vrsqrt.f32 %v288_v9  ;;  %vm295_vm9 = vweird.f32 %v288_v9 }
 0x313   :  { %v349_v10 = vpop.eup %348 }
 0x314   :  { %v290_v11 = vmul.f32 %v349_v10, %v288_v9  ;;  %vm296_vm8 = vweird.f32 %v349_v10 }
 0x315   :  { %vm297_vm10 = vmor %vm295_vm9, %vm296_vm8 }
 0x316   :  { %v291_v12 = vmul.f32 %v349_v10, %v290_v11 }
 0x318   :  { %v292_v13 = vmul.f32 0.5, %v291_v12 }
 0x31a   :  { %v293_v14 = vsub.f32 1.5, %v292_v13 }
 0x31c   :  { %v294_v15 = vmul.f32 %v349_v10, %v293_v14 }
 0x31e   :  { %v298_v16 = vsel %vm297_vm10, %v349_v10, %v294_v15 }
 0x31f   :  { %v299_v17 = vmul.f32 %v298_v16, %v261_v48 }
 0x321   :  { %301 = vrot.lane.b32.xlu2 %v299_v17, %s377_s7 }
 0x37b   :  { %v302_v18 = vpop.permute.xlu2 %301 }
 0x37c   :  { %304 = vst.msk [vmem:[#allocation3 + $0x8] sm:$0xff] %vm263_vm4, %v302_v18 }
 0x37d   :  { %319 = dma.vmem_to_hbm [thread:$0]  %s312_s13, 256, %s314_s15, [#allocation4], %s380_s16, %s380_s16, %s381_s17  }
 0x37e   :  { %374 = dma.done.wait [#allocation4], 256  }
 0x37f   :  { %375 = vsyncadd [#allocation4], 4294967040 }
 0x380   :  { %326 = vsyncpa [#allocation4], 1 }

</bundles_post_ra>
